<compile_context>
chip_gen: v5e
topology: v5e:2x2
jax: 0.10.0
libtpu: 0.0.40
codegen_flags: <defaults>
</compile_context>

<pallas_src>
import functools

import numpy as np
import jax
import jax.numpy as jnp
from jax import lax
from jax.experimental import pallas as pl
from jax.experimental.pallas import tpu as pltpu


def importance_center(normalization_mode: str) -> float:
    """Mirror of PostProcess.importanceCenter (host-side helper)."""
    if normalization_mode in ("basic", "softplus"):
        return 0.5
    if normalization_mode == "sigmoid":
        return 0.0
    raise ValueError("unknown value for normalizationMode: " + normalization_mode)


def _bilinear_matrix(in_size: int, scale: int) -> np.ndarray:
    """(in_size*scale, in_size) matrix reproducing torch bilinear upsampling
    with align_corners=False (half-pixel centers, clamped source indices)."""
    out_size = in_size * scale
    o = np.arange(out_size, dtype=np.float64)
    src = (o + 0.5) / scale - 0.5
    src = np.clip(src, 0.0, None)                    # PyTorch clamps at 0
    i0 = np.minimum(np.floor(src).astype(np.int64), in_size - 1)
    i1 = np.minimum(i0 + 1, in_size - 1)
    frac = src - i0
    m = np.zeros((out_size, in_size), dtype=np.float32)
    np.add.at(m, (np.arange(out_size), i0), (1.0 - frac).astype(np.float32))
    np.add.at(m, (np.arange(out_size), i1), frac.astype(np.float32))
    return m


def _round_up(x: int, m: int) -> int:
    return ((x + m - 1) // m) * m


@functools.lru_cache(maxsize=32)
def _constants(H, W, scale_f, pad, BB, mxu_dtype_name):
    """Host-built constant operands, cached across calls."""
    mxu_dtype = jnp.dtype(mxu_dtype_name)

    # per-image column mask tiled across the BB lane-packed images -> (1, BB*W)
    colm = ((np.arange(W) >= pad) & (np.arange(W) < W - pad)).astype(np.float32)
    colmask = np.tile(colm, BB)[None, :]

    # block-diagonal ones: (row sums) @ ones -> per-image lane-block sums.
    # Entries are exactly 1.0, so bf16 storage is lossless; 1/n_inner is
    # folded into the scale inside the kernel.
    ones_bd = np.kron(np.eye(BB, dtype=np.float32),
                      np.ones((W, W), dtype=np.float32))          # (BB*W, BB*W)

    # separable bilinear interpolation matrices (column transform block-diag)
    A = _bilinear_matrix(H, scale_f)                               # (Ho, H)
    Bt = _bilinear_matrix(W, scale_f).T                            # (W, Wo)
    big_bt = np.kron(np.eye(BB, dtype=np.float32), Bt)             # (BB*W, BB*Wo)

    return (jnp.asarray(colmask),
            jnp.asarray(ones_bd, dtype=jnp.bfloat16),
            jnp.asarray(A, dtype=mxu_dtype),
            jnp.asarray(big_bt, dtype=mxu_dtype))


def _post_process_kernel(*refs, min_value, mean_value, n_inner, pad, mode,
                         post_upscale, a_first, mxu_dtype, gb):
    if post_upscale == 1:
        x_ref, colmask_ref, ones_ref, out_ref, stats_ref = refs
        a_ref = bbt_ref = None
    else:
        x_ref, colmask_ref, ones_ref, a_ref, bbt_ref, out_ref, stats_ref = refs

    H = x_ref.shape[1]

    # loop-invariant operands: loaded / built once per grid step
    colmask = colmask_ref[...]                                    # (1, BB*W)
    ones_bd = ones_ref[...].astype(jnp.float32)                   # (BB*W, BB*W)
    rows = lax.broadcasted_iota(jnp.int32, (H, 1), 0)
    row_ok = jnp.logical_and(rows >= pad, rows < H - pad).astype(jnp.float32)
    if post_upscale != 1:
        a_mat = a_ref[...]                                        # (Ho, H)
        bbt_mat = bbt_ref[...]                                    # (BB*W, BB*Wo)

    inv_n = 1.0 / n_inner
    gain = (mean_value - min_value) * n_inner

    def body(i, carry):
        x = x_ref[i].astype(jnp.float32)                          # (H, BB*W)
        if mode == "basic":
            act = jnp.maximum(x, 0.0)
        elif mode == "softplus":
            act = jax.nn.softplus(x)
        elif mode == "sigmoid":
            act = jax.nn.sigmoid(x)
        else:
            raise ValueError("unknown value for normalizationMode: " + mode)

        # zero outside the cropped inner region (rows via iota, cols via mask)
        act = act * row_ok * colmask

        # per-image inner-region sum: sublane reduce (XLU), then a tiny
        # (1,BBW)x(BBW,BBW) block-diagonal matmul broadcasting it per image.
        row = jnp.sum(act, axis=0, keepdims=True)                 # (1, BB*W)
        sums = jnp.dot(row, ones_bd, preferred_element_type=jnp.float32)

        # lane-dense stats slab: column c carries its image's mean
        stats_ref[i] = sums * inv_n

        inv = pl.reciprocal(jnp.maximum(sums, 1e-12), approx=True)
        # act is zero outside the inner region, so this is exactly
        # "normalize inside, constant min_value re-padding outside".
        norm = act * (gain * inv) + min_value                     # (H, BB*W)

        if post_upscale == 1:
            out = norm                                            # exact path
        else:
            n = norm.astype(mxu_dtype)
            if a_first:
                tmp = jnp.dot(a_mat, n, preferred_element_type=jnp.float32)
                out = jnp.dot(tmp.astype(mxu_dtype), bbt_mat,
                              preferred_element_type=jnp.float32)
            else:
                tmp = jnp.dot(n, bbt_mat, preferred_element_type=jnp.float32)
                out = jnp.dot(a_mat, tmp.astype(mxu_dtype),
                              preferred_element_type=jnp.float32)
        out_ref[i] = out.astype(out_ref.dtype)
        return carry

    lax.fori_loop(0, gb, body, 0, unroll=True)


def _choose_bb(B: int, W: int) -> int:
    """Lane packing factor: pack BB images along the 128-lane axis.

    Targets 256 lanes (fills the 256-wide MXU on v6e/v7x) but never drops
    below a 128-multiple lane width when W divides 128 (lane-dense stores)."""
    if W < 256 and 128 % W == 0:
        bb128 = 128 // W
        bb256 = 256 // W
        return bb256 if B > bb128 else bb128
    # TODO(synk): when W is not a divisor of 128 the lane width is not a
    #             multiple of 128 (masked stores); lane padding not implemented.
    return max(1, min(B, 256 // W)) if W < 256 else 1


def post_process(img, *, min_value, mean_value, post_upscale,
                 normalize_padding, normalization_mode,
                 use_bf16_mxu=True, out_dtype=jnp.float32,
                 packed_layout=False):
    assert img.ndim == 4
    assert img.shape[1] == 1
    if normalization_mode not in ("basic", "softplus", "sigmoid"):
        raise ValueError("unknown value for normalizationMode: "
                         + str(normalization_mode))

    B, _, H, W = img.shape
    pad = int(normalize_padding)
    scale_f = int(post_upscale)
    assert 2 * pad < H and 2 * pad < W, "normalizePadding too large for image"
    Ho, Wo = H * scale_f, W * scale_f

    # ---- lane packing & per-step group batching ---------------------------
    BB = _choose_bb(B, W)
    BBW, BBWo = BB * W, BB * Wo
    n_groups = -(-B // BB)

    x = img[:, 0, :, :]               # keep native dtype; cast to f32 in-kernel
    x_bytes = jnp.dtype(x.dtype).itemsize
    out_bytes = jnp.dtype(out_dtype).itemsize

    # groups per grid step: amortize the fixed per-step overhead, stay within a
    # VMEM budget, and keep >=2 grid steps when possible (v7x megacore).
    per_group = 2 * (H * BBW * x_bytes + Ho * BBWo * out_bytes + 8 * BBW * 4)
    Gb = max(1, min(8, n_groups, (24 << 20) // max(per_group, 1)))
    if n_groups > 1:
        Gb = min(Gb, -(-n_groups // 2))
    G = -(-n_groups // Gb)
    NG = G * Gb
    Bp = NG * BB

    if Bp != B:
        x = jnp.concatenate([x, jnp.zeros((Bp - B, H, W), x.dtype)], axis=0)
    # (NG, BB, H, W) -> (NG, H, BB, W) -> (NG, H, BB*W): lane c = b*W + w
    x_packed = x.reshape(NG, BB, H, W).transpose(0, 2, 1, 3).reshape(NG, H, BBW)

    mxu_dtype = jnp.bfloat16 if (use_bf16_mxu and scale_f > 1) else jnp.float32
    colmask, ones_bd, A, big_bt = _constants(H, W, scale_f, pad, BB,
                                             jnp.dtype(mxu_dtype).name)

    # matmul order minimizing MXU work, with dims rounded up to the MXU tile
    r = lambda d: _round_up(d, 256)
    flops_a_first = r(Ho) * r(H) * r(BBW) + r(Ho) * r(BBW) * r(BBWo)
    flops_b_first = r(H) * r(BBW) * r(BBWo) + r(Ho) * r(H) * r(BBWo)
    a_first = bool(flops_a_first <= flops_b_first)

    n_inner = float((H - 2 * pad) * (W - 2 * pad))
    kernel = functools.partial(
        _post_process_kernel,
        min_value=float(min_value), mean_value=float(mean_value),
        n_inner=n_inner, pad=pad, mode=normalization_mode,
        post_upscale=scale_f, a_first=a_first, mxu_dtype=mxu_dtype, gb=Gb)

    # VMEM estimate: image blocks double-buffered, constants (worst case) too.
    mxu_bytes = jnp.dtype(mxu_dtype).itemsize
    const_bytes = 8 * BBW * 4 + BBW * BBW * 2
    if scale_f > 1:
        const_bytes += (Ho * H + BBW * BBWo) * mxu_bytes
    vmem_est = Gb * per_group + 2 * const_bytes
    vmem_limit = None
    if vmem_est > (12 << 20):
        vmem_limit = int(min(max(2 * vmem_est, 32 << 20), 64 << 20))
    compiler_params = pltpu.CompilerParams(
        dimension_semantics=("parallel",), vmem_limit_bytes=vmem_limit)

    operands = [x_packed, colmask, ones_bd]
    if scale_f > 1:
        operands += [A, big_bt]

    def build(use_buffered_consts):
        # Constant operands never change across the grid -> single-buffer them.
        const_kw = ({"pipeline_mode": pl.Buffered(1)}
                    if use_buffered_consts else {})
        in_specs = [
            pl.BlockSpec((Gb, H, BBW), lambda g: (g, 0, 0)),          # packed imgs
            pl.BlockSpec((1, BBW), lambda g: (0, 0), **const_kw),     # column mask
            pl.BlockSpec((BBW, BBW), lambda g: (0, 0), **const_kw),   # block-diag 1s
        ]
        if scale_f > 1:
            in_specs += [
                pl.BlockSpec((Ho, H), lambda g: (0, 0), **const_kw),      # A
                pl.BlockSpec((BBW, BBWo), lambda g: (0, 0), **const_kw),  # kron(I,Bt)
            ]
        return pl.pallas_call(
            kernel,
            out_shape=(jax.ShapeDtypeStruct((NG, Ho, BBWo), out_dtype),
                       jax.ShapeDtypeStruct((NG, 1, BBW), jnp.float32)),
            grid_spec=pltpu.PrefetchScalarGridSpec(
                num_scalar_prefetch=0,
                grid=(G,),
                in_specs=in_specs,
                out_specs=[pl.BlockSpec((Gb, Ho, BBWo), lambda g: (g, 0, 0)),
                           pl.BlockSpec((Gb, 1, BBW), lambda g: (g, 0, 0))]),
            compiler_params=compiler_params)

    try:
        out_p, stats_p = build(True)(*operands)
    except Exception:
        # pipeline_mode=pl.Buffered may be unavailable in some JAX builds; the
        # constants are only DMA'd once either way (their block index is fixed),
        # so fall back to default double buffering.
        out_p, stats_p = build(False)(*operands)

    # ---- unpack lane-packed results back to [B, Ho, Wo] / [B] --------------
    stats = stats_p.reshape(NG, BB, W)[:, :, 0].reshape(Bp)[:B]
    if packed_layout:
        # caller accepts the packed (NG, Ho, BB*Wo) slab: skip the unpack
        # transpose (saves a full HBM read+write of the upsampled tensor).
        return out_p, stats

    out = (out_p.reshape(NG, Ho, BB, Wo)
                .transpose(0, 2, 1, 3)
                .reshape(Bp, Ho, Wo)[:B])
    return out, stats


def _reference_post_process(img, *, min_value, mean_value, post_upscale,
                            normalize_padding, normalization_mode):
    """Pure-numpy (f64) reference of the same reconstruction."""
    x = np.asarray(img)[:, 0].astype(np.float64)
    B, H, W = x.shape
    p = int(normalize_padding)
    inner = x[:, p:H - p, p:W - p]
    if normalization_mode == "basic":
        act = np.maximum(inner, 0.0)
    elif normalization_mode == "softplus":
        act = np.logaddexp(inner, 0.0)
    elif normalization_mode == "sigmoid":
        act = 1.0 / (1.0 + np.exp(-inner))
    else:
        raise ValueError(normalization_mode)
    mean = act.mean(axis=(1, 2))
    stats = mean
    scale = (mean_value - min_value) / np.maximum(mean, 1e-12)
    norm = act * scale[:, None, None] + min_value
    full = np.full((B, H, W), min_value, dtype=np.float64)
    full[:, p:H - p, p:W - p] = norm
    if post_upscale == 1:
        return full, stats
    A = _bilinear_matrix(H, post_upscale).astype(np.float64)
    Bt = _bilinear_matrix(W, post_upscale).T.astype(np.float64)
    out = np.einsum("oh,bhw,wx->box", A, full, Bt)
    return out, stats


if __name__ == "__main__":
    key = jax.random.PRNGKey(0)
    B, C, H, W = 2, 1, 16, 16
    img = jax.random.normal(key, (B, C, H, W), dtype=jnp.float32)

    params = dict(min_value=0.01, mean_value=0.2, post_upscale=2,
                  normalize_padding=2, normalization_mode="softplus")

    out, stats = post_process(img, **params)
    jax.block_until_ready((out, stats))

    assert out.shape == (B, H * params["post_upscale"], W * params["post_upscale"])
    assert stats.shape == (B,)
    assert bool(jnp.all(jnp.isfinite(out)))
    assert bool(jnp.all(jnp.isfinite(stats)))

    # correctness vs. a pure-numpy reference of the same reconstruction
    # (loose tolerance on the image: bf16 MXU upsample + approx reciprocal)
    ref_out, ref_stats = _reference_post_process(np.asarray(img), **params)
    np.testing.assert_allclose(np.asarray(stats), ref_stats, rtol=1e-3, atol=1e-5)
    np.testing.assert_allclose(np.asarray(out), ref_out, rtol=5e-2, atol=2e-2)

    print("KERNEL_OK")
</pallas_src>

<mosaic_0001>
module attributes {stable_mosaic.version = 11 : i64} {
  func.func @_post_process_kernel(%arg0: i32, %arg1: memref<1x16x128xf32, #tpu.memory_space<vmem>>, %arg2: memref<1x128xf32, #tpu.memory_space<vmem>>, %arg3: memref<128x128xbf16, #tpu.memory_space<vmem>>, %arg4: memref<32x16xbf16, #tpu.memory_space<vmem>>, %arg5: memref<128x256xbf16, #tpu.memory_space<vmem>>, %arg6: memref<1x32x256xf32, #tpu.memory_space<vmem>>, %arg7: memref<1x1x128xf32, #tpu.memory_space<vmem>>) attributes {dimension_semantics = [#tpu.dimension_semantics<parallel>], iteration_bounds = array<i64: 1>, scalar_prefetch = 0 : i64, scratch_operands = 0 : i64, tpu.core_type = #tpu.core_type<tc>, window_params = [{transform_indices = @transform_0, window_bounds = array<i64: 1, 16, 128>}, {pipeline_mode = #tpu.pipeline_mode<synchronous>, transform_indices = @transform_1, window_bounds = array<i64: 1, 128>}, {pipeline_mode = #tpu.pipeline_mode<synchronous>, transform_indices = @transform_2, window_bounds = array<i64: 128, 128>}, {pipeline_mode = #tpu.pipeline_mode<synchronous>, transform_indices = @transform_3, window_bounds = array<i64: 32, 16>}, {pipeline_mode = #tpu.pipeline_mode<synchronous>, transform_indices = @transform_4, window_bounds = array<i64: 128, 256>}, {transform_indices = @transform_5, window_bounds = array<i64: 1, 32, 256>}, {transform_indices = @transform_6, window_bounds = array<i64: 1, 1, 128>}]} {
    %c0 = arith.constant 0 : index
    %c0_0 = arith.constant 0 : index
    %0 = vector.load %arg2[%c0, %c0_0] : memref<1x128xf32, #tpu.memory_space<vmem>>, vector<1x128xf32>
    %c0_1 = arith.constant 0 : index
    %c0_2 = arith.constant 0 : index
    %1 = vector.load %arg3[%c0_1, %c0_2] : memref<128x128xbf16, #tpu.memory_space<vmem>>, vector<128x128xbf16>
    %2 = arith.extf %1 : vector<128x128xbf16> to vector<128x128xf32>
    %3 = tpu.iota {dimensions = array<i32: 0>} : vector<16x1xi32>
    %c2_i32 = arith.constant 2 : i32
    %4 = vector.broadcast %c2_i32 : i32 to vector<16x1xi32>
    %5 = arith.cmpi sge, %3, %4 : vector<16x1xi32>
    %c14_i32 = arith.constant 14 : i32
    %6 = vector.broadcast %c14_i32 : i32 to vector<16x1xi32>
    %7 = arith.cmpi slt, %3, %6 : vector<16x1xi32>
    %8 = arith.andi %5, %7 : vector<16x1xi1>
    %9 = arith.extui %8 : vector<16x1xi1> to vector<16x1xi32>
    %10 = arith.sitofp %9 : vector<16x1xi32> to vector<16x1xf32>
    %c0_3 = arith.constant 0 : index
    %c0_4 = arith.constant 0 : index
    %11 = vector.load %arg4[%c0_3, %c0_4] : memref<32x16xbf16, #tpu.memory_space<vmem>>, vector<32x16xbf16>
    %c0_5 = arith.constant 0 : index
    %c0_6 = arith.constant 0 : index
    %12 = vector.load %arg5[%c0_5, %c0_6] : memref<128x256xbf16, #tpu.memory_space<vmem>>, vector<128x256xbf16>
    %c0_i32 = arith.constant 0 : i32
    %13 = arith.index_cast %c0_i32 : i32 to index
    %c0_7 = arith.constant 0 : index
    %c0_8 = arith.constant 0 : index
    %14 = vector.load %arg1[%13, %c0_7, %c0_8] : memref<1x16x128xf32, #tpu.memory_space<vmem>>, vector<1x16x128xf32>
    %15 = vector.shape_cast %14 : vector<1x16x128xf32> to vector<16x128xf32>
    %cst = arith.constant 0.000000e+00 : f32
    %16 = vector.broadcast %cst : f32 to vector<16x128xf32>
    %17 = arith.maximumf %15, %16 : vector<16x128xf32>
    %18 = vector.broadcast %cst : f32 to vector<16x128xf32>
    %19 = arith.subf %15, %18 : vector<16x128xf32>
    %20 = arith.cmpf one, %19, %19 : vector<16x128xf32>
    %21 = vector.broadcast %cst : f32 to vector<16x128xf32>
    %22 = arith.addf %15, %21 : vector<16x128xf32>
    %23 = math.absf %19 : vector<16x128xf32>
    %cst_9 = arith.constant 0.000000e+00 : f32
    %24 = vector.broadcast %cst_9 : f32 to vector<16x128xf32>
    %25 = arith.subf %24, %23 : vector<16x128xf32>
    %26 = math.exp %25 : vector<16x128xf32>
    %27 = math.log1p %26 : vector<16x128xf32>
    %28 = arith.addf %17, %27 : vector<16x128xf32>
    %29 = arith.select %20, %22, %28 : vector<16x128xi1>, vector<16x128xf32>
    %30 = vector.broadcast %10 : vector<16x1xf32> to vector<16x128xf32>
    %31 = arith.mulf %29, %30 : vector<16x128xf32>
    %32 = vector.broadcast %0 : vector<1x128xf32> to vector<16x128xf32>
    %33 = arith.mulf %31, %32 : vector<16x128xf32>
    %cst_10 = arith.constant dense<0.000000e+00> : vector<128xf32>
    %34 = vector.multi_reduction <add>, %33, %cst_10 [0] : vector<16x128xf32> to vector<128xf32>
    %35 = vector.shape_cast %34 : vector<128xf32> to vector<1x128xf32>
    %cst_11 = arith.constant dense<0.000000e+00> : vector<1x128xf32>
    %36 = tpu.matmul %35, %2, %cst_11 {dimension_numbers = #tpu.dot_dimension_numbers<[1], [0], [0], [1], [0, 0, 1, 1], [], []>} : vector<1x128xf32>, vector<128x128xf32>, vector<1x128xf32> -> vector<1x128xf32>
    %cst_12 = arith.constant 0.0069444445 : f32
    %37 = vector.broadcast %cst_12 : f32 to vector<1x128xf32>
    %38 = arith.mulf %36, %37 : vector<1x128xf32>
    %39 = arith.index_cast %c0_i32 : i32 to index
    %c0_13 = arith.constant 0 : index
    %c0_14 = arith.constant 0 : index
    %40 = vector.load %arg7[%39, %c0_13, %c0_14] : memref<1x1x128xf32, #tpu.memory_space<vmem>>, vector<1x1x128xf32>
    %41 = vector.shape_cast %40 : vector<1x1x128xf32> to vector<1x128xf32>
    %42 = vector.shape_cast %38 : vector<1x128xf32> to vector<1x1x128xf32>
    tpu.vector_store %arg7[%39, %c0_13, %c0_14], %42 {strides = array<i32>} : memref<1x1x128xf32, #tpu.memory_space<vmem>>, vector<1x1x128xf32>,
    %cst_15 = arith.constant 9.99999996E-13 : f32
    %43 = vector.broadcast %cst_15 : f32 to vector<1x128xf32>
    %44 = arith.maximumf %36, %43 : vector<1x128xf32>
    %45 = tpu.reciprocal %44 {approx = true} : vector<1x128xf32> -> vector<1x128xf32>
    %cst_16 = arith.constant 2.736000e+01 : f32
    %46 = vector.broadcast %cst_16 : f32 to vector<1x128xf32>
    %47 = arith.mulf %46, %45 : vector<1x128xf32>
    %48 = vector.broadcast %47 : vector<1x128xf32> to vector<16x128xf32>
    %49 = arith.mulf %33, %48 : vector<16x128xf32>
    %cst_17 = arith.constant 0.00999999977 : f32
    %50 = vector.broadcast %cst_17 : f32 to vector<16x128xf32>
    %51 = arith.addf %49, %50 : vector<16x128xf32>
    %52 = arith.truncf %51 : vector<16x128xf32> to vector<16x128xbf16>
    %cst_18 = arith.constant dense<0.000000e+00> : vector<32x128xf32>
    %53 = tpu.matmul %11, %52, %cst_18 {dimension_numbers = #tpu.dot_dimension_numbers<[1], [0], [0], [1], [0, 0, 1, 1], [], []>} : vector<32x16xbf16>, vector<16x128xbf16>, vector<32x128xf32> -> vector<32x128xf32>
    %54 = arith.truncf %53 : vector<32x128xf32> to vector<32x128xbf16>
    %cst_19 = arith.constant dense<0.000000e+00> : vector<32x256xf32>
    %55 = tpu.matmul %54, %12, %cst_19 {dimension_numbers = #tpu.dot_dimension_numbers<[1], [0], [0], [1], [0, 0, 1, 1], [], []>} : vector<32x128xbf16>, vector<128x256xbf16>, vector<32x256xf32> -> vector<32x256xf32>
    %56 = arith.index_cast %c0_i32 : i32 to index
    %c0_20 = arith.constant 0 : index
    %c0_21 = arith.constant 0 : index
    %57 = vector.load %arg6[%56, %c0_20, %c0_21] : memref<1x32x256xf32, #tpu.memory_space<vmem>>, vector<1x32x256xf32>
    %58 = vector.shape_cast %57 : vector<1x32x256xf32> to vector<32x256xf32>
    %59 = vector.shape_cast %55 : vector<32x256xf32> to vector<1x32x256xf32>
    tpu.vector_store %arg6[%56, %c0_20, %c0_21], %59 {strides = array<i32>} : memref<1x32x256xf32, #tpu.memory_space<vmem>>, vector<1x32x256xf32>,
    %c1_i32 = arith.constant 1 : i32
    return
  }
  func.func @transform_0(%arg0: i32) -> (i32, i32, i32) {
    %c0_i32 = arith.constant 0 : i32
    %c0_i32_0 = arith.constant 0 : i32
    %c0_i32_1 = arith.constant 0 : i32
    return %arg0, %c0_i32, %c0_i32_0 : i32, i32, i32
  }
  func.func @transform_1(%arg0: i32) -> (i32, i32) {
    %c0_i32 = arith.constant 0 : i32
    %c0_i32_0 = arith.constant 0 : i32
    %c0_i32_1 = arith.constant 0 : i32
    return %c0_i32, %c0_i32_0 : i32, i32
  }
  func.func @transform_2(%arg0: i32) -> (i32, i32) {
    %c0_i32 = arith.constant 0 : i32
    %c0_i32_0 = arith.constant 0 : i32
    %c0_i32_1 = arith.constant 0 : i32
    return %c0_i32, %c0_i32_0 : i32, i32
  }
  func.func @transform_3(%arg0: i32) -> (i32, i32) {
    %c0_i32 = arith.constant 0 : i32
    %c0_i32_0 = arith.constant 0 : i32
    %c0_i32_1 = arith.constant 0 : i32
    return %c0_i32, %c0_i32_0 : i32, i32
  }
  func.func @transform_4(%arg0: i32) -> (i32, i32) {
    %c0_i32 = arith.constant 0 : i32
    %c0_i32_0 = arith.constant 0 : i32
    %c0_i32_1 = arith.constant 0 : i32
    return %c0_i32, %c0_i32_0 : i32, i32
  }
  func.func @transform_5(%arg0: i32) -> (i32, i32, i32) {
    %c0_i32 = arith.constant 0 : i32
    %c0_i32_0 = arith.constant 0 : i32
    %c0_i32_1 = arith.constant 0 : i32
    return %arg0, %c0_i32, %c0_i32_0 : i32, i32, i32
  }
  func.func @transform_6(%arg0: i32) -> (i32, i32, i32) {
    %c0_i32 = arith.constant 0 : i32
    %c0_i32_0 = arith.constant 0 : i32
    %c0_i32_1 = arith.constant 0 : i32
    return %arg0, %c0_i32, %c0_i32_0 : i32, i32, i32
  }
}

module attributes {stable_mosaic.version = 11 : i64} {
  func.func @_post_process_kernel(%arg0: i32, %arg1: memref<1x16x128xf32, #tpu.memory_space<vmem>>, %arg2: memref<1x128xf32, #tpu.memory_space<vmem>>, %arg3: memref<128x128xbf16, #tpu.memory_space<vmem>>, %arg4: memref<32x16xbf16, #tpu.memory_space<vmem>>, %arg5: memref<128x256xbf16, #tpu.memory_space<vmem>>, %arg6: memref<1x32x256xf32, #tpu.memory_space<vmem>>, %arg7: memref<1x1x128xf32, #tpu.memory_space<vmem>>) attributes {dimension_semantics = [#tpu.dimension_semantics<parallel>], iteration_bounds = array<i64: 1>, scalar_prefetch = 0 : i64, scratch_operands = 0 : i64, tpu.core_type = #tpu.core_type<tc>, window_params = [{transform_indices = @transform_0, window_bounds = array<i64: 1, 16, 128>}, {pipeline_mode = #tpu.pipeline_mode<synchronous>, transform_indices = @transform_1, window_bounds = array<i64: 1, 128>}, {pipeline_mode = #tpu.pipeline_mode<synchronous>, transform_indices = @transform_2, window_bounds = array<i64: 128, 128>}, {pipeline_mode = #tpu.pipeline_mode<synchronous>, transform_indices = @transform_3, window_bounds = array<i64: 32, 16>}, {pipeline_mode = #tpu.pipeline_mode<synchronous>, transform_indices = @transform_4, window_bounds = array<i64: 128, 256>}, {transform_indices = @transform_5, window_bounds = array<i64: 1, 32, 256>}, {transform_indices = @transform_6, window_bounds = array<i64: 1, 1, 128>}]} {
    %c0 = arith.constant 0 : index
    %c0_0 = arith.constant 0 : index
    %0 = vector.load %arg2[%c0, %c0_0] : memref<1x128xf32, #tpu.memory_space<vmem>>, vector<1x128xf32>
    %c0_1 = arith.constant 0 : index
    %c0_2 = arith.constant 0 : index
    %1 = vector.load %arg3[%c0_1, %c0_2] : memref<128x128xbf16, #tpu.memory_space<vmem>>, vector<128x128xbf16>
    %2 = arith.extf %1 : vector<128x128xbf16> to vector<128x128xf32>
    %3 = tpu.iota {dimensions = array<i32: 0>} : vector<16x1xi32>
    %c2_i32 = arith.constant 2 : i32
    %4 = vector.broadcast %c2_i32 : i32 to vector<16x1xi32>
    %5 = arith.cmpi sge, %3, %4 : vector<16x1xi32>
    %c14_i32 = arith.constant 14 : i32
    %6 = vector.broadcast %c14_i32 : i32 to vector<16x1xi32>
    %7 = arith.cmpi slt, %3, %6 : vector<16x1xi32>
    %8 = arith.andi %5, %7 : vector<16x1xi1>
    %9 = arith.extui %8 : vector<16x1xi1> to vector<16x1xi32>
    %10 = arith.sitofp %9 : vector<16x1xi32> to vector<16x1xf32>
    %c0_3 = arith.constant 0 : index
    %c0_4 = arith.constant 0 : index
    %11 = vector.load %arg4[%c0_3, %c0_4] : memref<32x16xbf16, #tpu.memory_space<vmem>>, vector<32x16xbf16>
    %c0_5 = arith.constant 0 : index
    %c0_6 = arith.constant 0 : index
    %12 = vector.load %arg5[%c0_5, %c0_6] : memref<128x256xbf16, #tpu.memory_space<vmem>>, vector<128x256xbf16>
    %c0_i32 = arith.constant 0 : i32
    %13 = arith.index_cast %c0_i32 : i32 to index
    %c0_7 = arith.constant 0 : index
    %c0_8 = arith.constant 0 : index
    %14 = vector.load %arg1[%13, %c0_7, %c0_8] : memref<1x16x128xf32, #tpu.memory_space<vmem>>, vector<1x16x128xf32>
    %15 = vector.shape_cast %14 : vector<1x16x128xf32> to vector<16x128xf32>
    %cst = arith.constant 0.000000e+00 : f32
    %16 = vector.broadcast %cst : f32 to vector<16x128xf32>
    %17 = arith.maximumf %15, %16 : vector<16x128xf32>
    %18 = vector.broadcast %cst : f32 to vector<16x128xf32>
    %19 = arith.subf %15, %18 : vector<16x128xf32>
    %20 = arith.cmpf one, %19, %19 : vector<16x128xf32>
    %21 = vector.broadcast %cst : f32 to vector<16x128xf32>
    %22 = arith.addf %15, %21 : vector<16x128xf32>
    %23 = math.absf %19 : vector<16x128xf32>
    %cst_9 = arith.constant 0.000000e+00 : f32
    %24 = vector.broadcast %cst_9 : f32 to vector<16x128xf32>
    %25 = arith.subf %24, %23 : vector<16x128xf32>
    %26 = math.exp %25 : vector<16x128xf32>
    %27 = math.log1p %26 : vector<16x128xf32>
    %28 = arith.addf %17, %27 : vector<16x128xf32>
    %29 = arith.select %20, %22, %28 : vector<16x128xi1>, vector<16x128xf32>
    %30 = vector.broadcast %10 : vector<16x1xf32> to vector<16x128xf32>
    %31 = arith.mulf %29, %30 : vector<16x128xf32>
    %32 = vector.broadcast %0 : vector<1x128xf32> to vector<16x128xf32>
    %33 = arith.mulf %31, %32 : vector<16x128xf32>
    %cst_10 = arith.constant dense<0.000000e+00> : vector<128xf32>
    %34 = vector.multi_reduction <add>, %33, %cst_10 [0] : vector<16x128xf32> to vector<128xf32>
    %35 = vector.shape_cast %34 : vector<128xf32> to vector<1x128xf32>
    %cst_11 = arith.constant dense<0.000000e+00> : vector<1x128xf32>
    %36 = tpu.matmul %35, %2, %cst_11 {dimension_numbers = #tpu.dot_dimension_numbers<[1], [0], [0], [1], [0, 0, 1, 1], [], []>} : vector<1x128xf32>, vector<128x128xf32>, vector<1x128xf32> -> vector<1x128xf32>
    %cst_12 = arith.constant 0.0069444445 : f32
    %37 = vector.broadcast %cst_12 : f32 to vector<1x128xf32>
    %38 = arith.mulf %36, %37 : vector<1x128xf32>
    %39 = arith.index_cast %c0_i32 : i32 to index
    %c0_13 = arith.constant 0 : index
    %c0_14 = arith.constant 0 : index
    %40 = vector.load %arg7[%39, %c0_13, %c0_14] : memref<1x1x128xf32, #tpu.memory_space<vmem>>, vector<1x1x128xf32>
    %41 = vector.shape_cast %40 : vector<1x1x128xf32> to vector<1x128xf32>
    %42 = vector.shape_cast %38 : vector<1x128xf32> to vector<1x1x128xf32>
    tpu.vector_store %arg7[%39, %c0_13, %c0_14], %42 {strides = array<i32>} : memref<1x1x128xf32, #tpu.memory_space<vmem>>, vector<1x1x128xf32>,
    %cst_15 = arith.constant 9.99999996E-13 : f32
    %43 = vector.broadcast %cst_15 : f32 to vector<1x128xf32>
    %44 = arith.maximumf %36, %43 : vector<1x128xf32>
    %45 = tpu.reciprocal %44 {approx = true} : vector<1x128xf32> -> vector<1x128xf32>
    %cst_16 = arith.constant 2.736000e+01 : f32
    %46 = vector.broadcast %cst_16 : f32 to vector<1x128xf32>
    %47 = arith.mulf %46, %45 : vector<1x128xf32>
    %48 = vector.broadcast %47 : vector<1x128xf32> to vector<16x128xf32>
    %49 = arith.mulf %33, %48 : vector<16x128xf32>
    %cst_17 = arith.constant 0.00999999977 : f32
    %50 = vector.broadcast %cst_17 : f32 to vector<16x128xf32>
    %51 = arith.addf %49, %50 : vector<16x128xf32>
    %52 = arith.truncf %51 : vector<16x128xf32> to vector<16x128xbf16>
    %cst_18 = arith.constant dense<0.000000e+00> : vector<32x128xf32>
    %53 = tpu.matmul %11, %52, %cst_18 {dimension_numbers = #tpu.dot_dimension_numbers<[1], [0], [0], [1], [0, 0, 1, 1], [], []>} : vector<32x16xbf16>, vector<16x128xbf16>, vector<32x128xf32> -> vector<32x128xf32>
    %54 = arith.truncf %53 : vector<32x128xf32> to vector<32x128xbf16>
    %cst_19 = arith.constant dense<0.000000e+00> : vector<32x256xf32>
    %55 = tpu.matmul %54, %12, %cst_19 {dimension_numbers = #tpu.dot_dimension_numbers<[1], [0], [0], [1], [0, 0, 1, 1], [], []>} : vector<32x128xbf16>, vector<128x256xbf16>, vector<32x256xf32> -> vector<32x256xf32>
    %56 = arith.index_cast %c0_i32 : i32 to index
    %c0_20 = arith.constant 0 : index
    %c0_21 = arith.constant 0 : index
    %57 = vector.load %arg6[%56, %c0_20, %c0_21] : memref<1x32x256xf32, #tpu.memory_space<vmem>>, vector<1x32x256xf32>
    %58 = vector.shape_cast %57 : vector<1x32x256xf32> to vector<32x256xf32>
    %59 = vector.shape_cast %55 : vector<32x256xf32> to vector<1x32x256xf32>
    tpu.vector_store %arg6[%56, %c0_20, %c0_21], %59 {strides = array<i32>} : memref<1x32x256xf32, #tpu.memory_space<vmem>>, vector<1x32x256xf32>,
    %c1_i32 = arith.constant 1 : i32
    return
  }
  func.func @transform_0(%arg0: i32) -> (i32, i32, i32) {
    %c0_i32 = arith.constant 0 : i32
    %c0_i32_0 = arith.constant 0 : i32
    %c0_i32_1 = arith.constant 0 : i32
    return %arg0, %c0_i32, %c0_i32_0 : i32, i32, i32
  }
  func.func @transform_1(%arg0: i32) -> (i32, i32) {
    %c0_i32 = arith.constant 0 : i32
    %c0_i32_0 = arith.constant 0 : i32
    %c0_i32_1 = arith.constant 0 : i32
    return %c0_i32, %c0_i32_0 : i32, i32
  }
  func.func @transform_2(%arg0: i32) -> (i32, i32) {
    %c0_i32 = arith.constant 0 : i32
    %c0_i32_0 = arith.constant 0 : i32
    %c0_i32_1 = arith.constant 0 : i32
    return %c0_i32, %c0_i32_0 : i32, i32
  }
  func.func @transform_3(%arg0: i32) -> (i32, i32) {
    %c0_i32 = arith.constant 0 : i32
    %c0_i32_0 = arith.constant 0 : i32
    %c0_i32_1 = arith.constant 0 : i32
    return %c0_i32, %c0_i32_0 : i32, i32
  }
  func.func @transform_4(%arg0: i32) -> (i32, i32) {
    %c0_i32 = arith.constant 0 : i32
    %c0_i32_0 = arith.constant 0 : i32
    %c0_i32_1 = arith.constant 0 : i32
    return %c0_i32, %c0_i32_0 : i32, i32
  }
  func.func @transform_5(%arg0: i32) -> (i32, i32, i32) {
    %c0_i32 = arith.constant 0 : i32
    %c0_i32_0 = arith.constant 0 : i32
    %c0_i32_1 = arith.constant 0 : i32
    return %arg0, %c0_i32, %c0_i32_0 : i32, i32, i32
  }
  func.func @transform_6(%arg0: i32) -> (i32, i32, i32) {
    %c0_i32 = arith.constant 0 : i32
    %c0_i32_0 = arith.constant 0 : i32
    %c0_i32_1 = arith.constant 0 : i32
    return %arg0, %c0_i32, %c0_i32_0 : i32, i32, i32
  }
}

</mosaic_0001>

<bundles_post_ra>
// kernel: tpu_custom_call.1
= control target key start
LH: loop header
LB: loop body
LE: loop exit
PB: predicated region body
PF: predicated region fallthrough
CT: control target
= control target key end

     0   :  { %12 = vsyncpa [#allocation3], 0  ;;  %s768_s0 = inlined_call_operand.vmem [shape: f32[1,16,128], index: 0, kind: input, shape index: {}]   ;;  %s769_s1 = inlined_call_operand.vmem [shape: f32[1,128], index: 1, kind: input, shape index: {}]   ;;  %s770_s2 = inlined_call_operand.hbm [shape: bf16[128,128], index: 2, kind: input, shape index: {}]   ;;  %s771_s3 = inlined_call_operand.vmem [shape: bf16[32,16], index: 3, kind: input, shape index: {}]   ;;  %s772_s4 = inlined_call_operand.hbm [shape: bf16[128,256], index: 4, kind: input, shape index: {}]   ;;  %s773_s5 = inlined_call_operand.hbm [shape: f32[1,32,256], index: 5, kind: output, shape index: {0}]   ;;  %s774_s6 = inlined_call_operand.hbm [shape: f32[1,1,128], index: 6, kind: output, shape index: {1}]  }
   0x1   :  { %13 = vsyncpa [#allocation6], 0 }
   0x2   :  { %14 = vsyncpa [#allocation4], 0 }
   0x3   :  { %15 = vsyncpa [#allocation9], 0  ;;  %s24_s23 = sshll.u32 %s770_s2, 4  ;;  %s673_s24 = smov [#allocation2]   ;;  %s25_s23 = int_to_ptr.hbm [resolvable:$true] %s24_s23 }
   0x4   :  { %s26_s25 = sshll.u32 %s673_s24, 4  ;;  %s39_s28 = sshll.u32 %s772_s4, 4  ;;  %s27_s25 = int_to_ptr.vmem [resolvable:$true] %s26_s25  ;;  %s40_s28 = int_to_ptr.hbm [resolvable:$true] %s39_s28 }
   0x5   :  { %s674_s29 = smov 64   ;;  %s675_s30 = smov 4  }
   0x6   :  { %32 = dma.hbm_to_vmem [thread:$0]  %s25_s23, 1024, %s27_s25, [#allocation3], %s674_s29, %s674_s29, %s675_s30  }
   0x7   :  { %s676_s7 = smov [#allocation5]   ;;  %s677_s9 = smov 128  }
   0x8   :  { %s41_s8 = sshll.u32 %s676_s7, 4  ;;  %s678_s10 = smov 8   ;;  %s42_s8 = int_to_ptr.vmem [resolvable:$true] %s41_s8 }
   0x9   :  { %47 = dma.hbm_to_vmem [thread:$0]  %s40_s28, 2048, %s42_s8, [#allocation6], %s677_s9, %s677_s9, %s678_s10  }
   0xa   :  { %665 = dma.done.wait [#allocation3], 1024  }
   0xb   :  { %666 = vsyncadd [#allocation3], 4294966272 }
   0xc   :  { %667 = dma.done.wait [#allocation6], 2048  }
   0xd   :  { %668 = vsyncadd [#allocation6], 4294965248  ;;  %v538_v0 = vld [vmem:[#allocation2 + $0x38] sm:$0xff]   ;;  %v537_v1 = vld [vmem:[#allocation2 + $0x30] sm:$0xff]   ;;  %v90_v24 = vlaneseq  ;;  %v679_v55 = vmov 0.0   ;;  %vm216_vm6 = vcmask 130048  }
   0xe   :  { %v531_v2 = vunpack.c.h.bf16 %v538_v0  ;;  %v530_v3 = vunpack.c.l.bf16 %v538_v0  ;;  %v527_v4 = vunpack.c.h.bf16 %v537_v1  ;;  %v728_v5 = vld [vmem:[%s768_s0] sm:$0xff]  ;;  %v733_v6 = vld [vmem:[%s768_s0 + $0x8] sm:$0xff]  ;;  %v526_v8 = vunpack.c.l.bf16 %v537_v1  ;;  %v534_v19 = vld [vmem:[#allocation2 + $0x18] sm:$0xff]   ;;  %s390_s20 = sshll.u32 %s774_s6, 4  ;;  %s681_s21 = smov [#allocation7]   ;;  %s391_s20 = int_to_ptr.hbm [resolvable:$true] %s390_s20 }
   0xf   :  { %v536_v7 = vld [vmem:[#allocation2 + $0x28] sm:$0xff]   ;;  %v131_v9 = vand.u32 2147483647, %v728_v5  ;;  %v132_v10 = vand.u32 2147483647, %v733_v6  ;;  %v535_v12 = vld [vmem:[#allocation2 + $0x20] sm:$0xff]   ;;  %v515_v21 = vunpack.c.h.bf16 %v534_v19  ;;  %v514_v23 = vunpack.c.l.bf16 %v534_v19 }
  0x10   :  { %175 = vmatpush.msra.mxu0 %v531_v2  ;;  %v523_v11 = vunpack.c.h.bf16 %v536_v7  ;;  %v522_v15 = vunpack.c.l.bf16 %v536_v7  ;;  %v519_v18 = vunpack.c.h.bf16 %v535_v12  ;;  %v518_v20 = vunpack.c.l.bf16 %v535_v12  ;;  %v533_v22 = vld [vmem:[#allocation2 + $0x10] sm:$0xff]   ;;  %v532_v30 = vld [vmem:[#allocation2 + $0x8] sm:$0xff]   ;;  %v501_v39 = vld [vmem:[#allocation2] sm:$0xff]   ;;  %s374_s22 = sshll.u32 %s681_s21, 4  ;;  %s376_s6 = sshll.u32 %s773_s5, 4  ;;  %s375_s22 = int_to_ptr.vmem [resolvable:$true] %s374_s22  ;;  %s377_s6 = int_to_ptr.hbm [resolvable:$true] %s376_s6 }
  0x11   :  { %v133_v13 = vsub.f32 0.0, %v131_v9  ;;  %v134_v14 = vsub.f32 0.0, %v132_v10  ;;  %v511_v27 = vunpack.c.h.bf16 %v533_v22  ;;  %v510_v33 = vunpack.c.l.bf16 %v533_v22  ;;  %v558_v61 = vld [vmem:[%s769_s1] ss:$0 sm:$0xff]  ;;  %v497_v22 = vld [vmem:[#allocation5 + $0x64] sm:$0xf0] }
  0x12   :  { %176 = vmatpush.msra.mxu0 %v530_v3  ;;  %v91_v34 = vshrl.u32 %v90_v24, 7  ;;  %v507_v36 = vunpack.c.h.bf16 %v532_v30  ;;  %v506_v41 = vunpack.c.l.bf16 %v532_v30  ;;  %v503_v45 = vunpack.c.h.bf16 %v501_v39  ;;  %v468_v19 = vld [vmem:[#allocation5 + $0x60] sm:$0xf]  ;;  %v470_v24 = vld [vmem:[#allocation5 + $0x68] sm:$0xf0]  ;;  %s682_s25 = smov 256  }
  0x13   :  { %v135_v16 = vmul.f32 1.442695, %v133_v13  ;;  %v137_v17 = vmul.f32 1.442695, %v134_v14  ;;  %v125_v46 = vmax.f32 %v728_v5, 0.0  ;;  %v126_v50 = vmax.f32 %v733_v6, 0.0 }
  0x14   :  { %177 = vmatpush.msra.mxu0 %v527_v4  ;;  %v92_v42 = vadd.s32 8, %v91_v34  ;;  %vm93_vm1 = vcmp.ge.s32.totalorder %v91_v34, 2  ;;  %v502_v52 = vunpack.c.l.bf16 %v501_v39  ;;  %vm127_vm4 = vcmp.ne.f32.partialorder %v728_v5, %v728_v5  ;;  %v462_v30 = vld [vmem:[#allocation5 + $0x58] sm:$0xf0]  ;;  %v490_v47 = vld [vmem:[#allocation5 + $0x34] sm:$0xf] }
  0x15   :  { %559 = vpow2.f32 %v135_v16  ;;  %v406_v56 = vsel %vm93_vm1, 1.0, %v679_v55  ;;  %vm128_vm5 = vcmp.ne.f32.partialorder %v733_v6, %v733_v6  ;;  %v499_v16 = vld [vmem:[#allocation5 + $0x74] sm:$0xf0]  ;;  %s683_s26 = smov 16  }
  0x16   :  { %178 = vmatpush.msra.mxu0 %v526_v8  ;;  %561 = vpow2.f32 %v137_v17  ;;  %vm96_vm3 = vcmp.lt.s32.totalorder %v92_v42, 14  ;;  %v493_v42 = vld [vmem:[#allocation5 + $0x44] sm:$0xf0] }
  0x17   :  { %v407_v59 = vsel %vm96_vm3, 1.0, %v679_v55  ;;  %v489_v55 = vld [vmem:[#allocation5 + $0x24] sm:$0xf0] }
  0x18   :  { %179 = vmatpush.msra.mxu0 %v523_v11 }
  0x1a   :  { %180 = vmatpush.msra.mxu0 %v522_v15 }
  0x1b   :  { %v560_v25 = vpop.eup %559 }
  0x1c   :  { %181 = vmatpush.msra.mxu0 %v519_v18  ;;  %v562_v26 = vpop.eup %561  ;;  %v139_v28 = vadd.f32 1.0, %v560_v25  ;;  %v142_v29 = vmul.f32 -0.5, %v560_v25  ;;  %v145_v37 = vand.u32 2147483647, %v560_v25  ;;  %v478_v18 = vld [vmem:[#allocation5 + $0x78] sm:$0xf0] }
  0x1d   :  { %v148_v31 = vadd.f32 1.0, %v562_v26  ;;  %v151_v32 = vmul.f32 -0.5, %v562_v26  ;;  %v154_v40 = vand.u32 2147483647, %v562_v26 }
  0x1e   :  { %182 = vmatpush.msra.mxu0 %v518_v20  ;;  %563 = vlog2.f32 %v139_v28  ;;  %v143_v35 = vadd.f32 1.0, %v142_v29  ;;  %vm738_vm0 = vcmp.lt.f32.partialorder %v145_v37, 0.0004427343  ;;  %v469_v28 = vor.u32 %v497_v22, %v468_v19  ;;  %v494_v29 = vld [vmem:[#allocation5 + $0x54] sm:$0xf] }
  0x1f   :  { %565 = vlog2.f32 %v148_v31  ;;  %v152_v38 = vadd.f32 1.0, %v151_v32  ;;  %vm155_vm2 = vcmp.lt.f32.partialorder %v154_v40, 0.0004427343  ;;  %v460_v31 = vld [vmem:[#allocation5 + $0x50] sm:$0xf] }
  0x20   :  { %183 = vmatpush.msra.mxu0 %v515_v21  ;;  %v144_v43 = vmul.f32 %v560_v25, %v143_v35  ;;  %v495_v32 = vld [vmem:[#allocation5 + $0x54] sm:$0xf0]  ;;  %v465_v35 = vor.u32 %v494_v29, %v462_v30  ;;  %v454_v40 = vld [vmem:[#allocation5 + $0x48] sm:$0xf0] }
  0x21   :  { %v153_v48 = vmul.f32 %v562_v26, %v152_v38  ;;  %v461_v39 = vor.u32 %v495_v32, %v460_v31 }
  0x22   :  { %184 = vmatpush.msra.mxu0 %v514_v23  ;;  %v496_v23 = vld [vmem:[#allocation5 + $0x64] sm:$0xf] }
  0x23   :  { %v473_v26 = vor.u32 %v496_v23, %v470_v24 }
  0x24   :  { %185 = vmatpush.msra.mxu0 %v511_v27  ;;  %v564_v44 = vpop.eup %563 }
  0x25   :  { %v566_v49 = vpop.eup %565  ;;  %v141_v51 = vmul.f32 0.6931472, %v564_v44  ;;  %v482_v44 = vld [vmem:[%s771_s3] sm:$0xff] }
  0x26   :  { %186 = vmatpush.msra.mxu0 %v510_v33  ;;  %v150_v53 = vmul.f32 0.6931472, %v566_v49  ;;  %v444_v49 = vld [vmem:[#allocation5 + $0x30] sm:$0xf] }
  0x27   :  { %v147_v54 = vsel %vm738_vm0, %v144_v43, %v141_v51 }
  0x28   :  { %187 = vmatpush.msra.mxu0 %v507_v36  ;;  %v156_v57 = vsel %vm155_vm2, %v153_v48, %v150_v53  ;;  %v157_v58 = vadd.f32 %v147_v54, %v125_v46  ;;  %v492_v36 = vld [vmem:[#allocation5 + $0x44] sm:$0xf]  ;;  %v446_v48 = vld [vmem:[#allocation5 + $0x38] sm:$0xf0]  ;;  %v483_v53 = vld [vmem:[%s771_s3 + $0x8] sm:$0xff]  ;;  %s680_s3 = smov [#allocation8]  }
  0x29   :  { %v158_v60 = vadd.f32 %v156_v57, %v126_v50  ;;  %v491_v50 = vld [vmem:[#allocation5 + $0x34] sm:$0xf0]  ;;  %v449_v51 = vor.u32 %v490_v47, %v446_v48  ;;  %v436_v54 = vld [vmem:[#allocation5 + $0x20] sm:$0xf]  ;;  %s388_s17 = sshll.u32 %s680_s3, 4  ;;  %s389_s17 = int_to_ptr.vmem [resolvable:$true] %s388_s17 }
  0x2a   :  { %188 = vmatpush.msra.mxu0 %v506_v41  ;;  %v159_v62 = vsel %vm127_vm4, %v728_v5, %v157_v58  ;;  %v476_v5 = vld [vmem:[#allocation5 + $0x70] sm:$0xf]  ;;  %v452_v41 = vld [vmem:[#allocation5 + $0x40] sm:$0xf]  ;;  %v437_v57 = vor.u32 %v489_v55, %v436_v54  ;;  %v438_v58 = vld [vmem:[#allocation5 + $0x28] sm:$0xf0] }
  0x2b   :  { %v160_v63 = vsel %vm128_vm5, %v733_v6, %v158_v60  ;;  %v161_v0 = vmul.f32 %v406_v56, %v159_v62  ;;  %v498_v6 = vld [vmem:[#allocation5 + $0x74] sm:$0xf]  ;;  %v477_v17 = vor.u32 %v499_v16, %v476_v5  ;;  %v453_v46 = vor.u32 %v493_v42, %v452_v41  ;;  %v488_v56 = vld [vmem:[#allocation5 + $0x24] sm:$0xf]  ;;  %v428_v60 = vld [vmem:[#allocation5 + $0x10] sm:$0xf] }
  0x2c   :  { %189 = vmatpush.msra.mxu0 %v503_v45  ;;  %v162_v1 = vmul.f32 %v407_v59, %v160_v63  ;;  %v481_v21 = vor.u32 %v498_v6, %v478_v18  ;;  %v457_v45 = vor.u32 %v492_v36, %v454_v40  ;;  %v441_v59 = vor.u32 %v488_v56, %v438_v58  ;;  %v486_v62 = vld [vmem:[#allocation5 + $0x14] sm:$0xf] }
  0x2d   :  { %v166_v2 = vmul.f32 %v558_v61, %v161_v0  ;;  %539 = vmatpush.bf16.msra.mxu2 %v477_v17  ;;  %v430_v0 = vld [vmem:[#allocation5 + $0x18] sm:$0xf0] }
  0x2e   :  { %190 = vmatpush.msra.mxu0 %v502_v52  ;;  %v167_v3 = vmul.f32 %v558_v61, %v162_v1  ;;  %343 = vmatpush.bf16.msra.mxu3 %v481_v21  ;;  %v445_v52 = vor.u32 %v491_v50, %v444_v49  ;;  %v487_v61 = vld [vmem:[#allocation5 + $0x14] sm:$0xf0]  ;;  %v433_v1 = vor.u32 %v486_v62, %v430_v0 }
  0x2f   :  { %v429_v63 = vor.u32 %v487_v61, %v428_v60 }
  0x30   :  { %v168_v4 = vadd.f32 %v167_v3, %v166_v2 }
  0x31   :  { %540 = vmatpush.bf16.msra.mxu2 %v469_v28 }
  0x32   :  { %v169_v7 = vrot.slane %v168_v4, 4  ;;  %344 = vmatpush.bf16.msra.mxu3 %v473_v26 }
  0x34   :  { %v170_v8 = vadd.f32 %v169_v7, %v168_v4  ;;  %v484_v4 = vld [vmem:[#allocation5 + $0x4] sm:$0xf] }
  0x35   :  { %541 = vmatpush.bf16.msra.mxu2 %v461_v39 }
  0x36   :  { %v171_v9 = vrot.slane %v170_v8, 2  ;;  %345 = vmatpush.bf16.msra.mxu3 %v465_v35 }
  0x38   :  { %v172_v10 = vadd.f32 %v171_v9, %v170_v8  ;;  %v422_v8 = vld [vmem:[#allocation5 + $0x8] sm:$0xf0] }
  0x39   :  { %542 = vmatpush.bf16.msra.mxu2 %v453_v46  ;;  %v425_v9 = vor.u32 %v484_v4, %v422_v8 }
  0x3a   :  { %v173_v11 = vrot.slane %v172_v10, 1  ;;  %346 = vmatpush.bf16.msra.mxu3 %v457_v45 }
  0x3c   :  { %v174_v12 = vadd.f32 %v173_v11, %v172_v10 }
  0x3d   :  { %543 = vmatpush.bf16.msra.mxu2 %v445_v52 }
  0x3e   :  { %191 = vmatmul.f32.vlgmr.msra.gmra.mxu0 %v174_v12  ;;  %347 = vmatpush.bf16.msra.mxu3 %v449_v51 }
  0x41   :  { %544 = vmatpush.bf16.msra.mxu2 %v437_v57 }
  0x42   :  { %348 = vmatpush.bf16.msra.mxu3 %v441_v59 }
  0x45   :  { %545 = vmatpush.bf16.msra.mxu2 %v429_v63 }
  0x46   :  { %349 = vmatpush.bf16.msra.mxu3 %v433_v1 }
  0x4a   :  { %350 = vmatpush.bf16.msra.mxu3 %v425_v9 }
  0xbb   :  { %v192_v13 = vpop.f32.mrf.mxu0 }
  0xbc   :  { %v195_v14 = vmul.f32 0.0069444445, %v192_v13  ;;  %v197_v15 = vmax.f32 %v192_v13, 1e-12 }
  0xbe   :  { %196 = vst [vmem:[#allocation8] sm:$0x1] %v195_v14  ;;  %567 = vrcp.f32 %v197_v15 }
  0xbf   :  { %393 = dma.vmem_to_hbm [thread:$0]  %s389_s17, 16, %s391_s20, [#allocation9]  }
  0xc4   :  { %v568_v20 = vpop.eup %567 }
  0xc5   :  { %v199_v25 = vmul.f32 27.36, %v568_v20 }
  0xc7   :  { %v200_v27 = vperm.slane %v199_v25, 0 }
  0xc9   :  { %v201_v33 = vmul.f32 %v200_v27, %v166_v2  ;;  %v202_v34 = vmul.f32 %v200_v27, %v167_v3  ;;  %v420_v2 = vld [vmem:[#allocation5] sm:$0xf]  ;;  %v485_v3 = vld [vmem:[#allocation5 + $0x4] sm:$0xf0] }
  0xca   :  { %v421_v7 = vor.u32 %v485_v3, %v420_v2 }
  0xcb   :  { %v203_v37 = vadd.f32 0.01, %v201_v33  ;;  %v204_v38 = vadd.f32 0.01, %v202_v34 }
  0xcc   :  { %546 = vmatpush.bf16.msra.mxu2 %v421_v7 }
  0xcd   :  { %v205_v43 = vpack.c.bf16 %v204_v38, %v203_v37 }
  0xcf   :  { %230 = vmatpush.bf16.msra.mxu1 %v205_v43 }
  0xd2   :  { %416 = vmatmul.msk.bf16.vlgmr.msra.gmra.mxu1 %vm216_vm6, %v482_v44 }
  0xd3   :  { %324 = vmatpush.bf16.msrb.mxu1 %v477_v17 }
  0xd7   :  { %325 = vmatpush.bf16.msrb.mxu1 %v469_v28 }
  0xdb   :  { %326 = vmatpush.bf16.msrb.mxu1 %v461_v39 }
  0xdf   :  { %327 = vmatpush.bf16.msrb.mxu1 %v453_v46 }
  0xe2   :  { %417 = vmatmul.msk.bf16.gmra.mxu1 %vm216_vm6, %v483_v53 }
  0xe3   :  { %328 = vmatpush.bf16.msrb.mxu1 %v445_v52 }
  0xe7   :  { %329 = vmatpush.bf16.msrb.mxu1 %v437_v57 }
  0xeb   :  { %330 = vmatpush.bf16.msrb.mxu1 %v429_v63 }
  0xef   :  { %331 = vmatpush.bf16.msrb.mxu1 %v421_v7 }
 0x14f   :  { %v232_v10 = vpop.f32.mrf.mxu1 }
 0x157   :  { %v234_v11 = vpop.f32.mrf.mxu1 }
 0x158   :  { %v242_v12 = vpack.c.bf16 %v234_v11, %v232_v10 }
 0x15a   :  { %332 = vmatmul.bf16.vlgmr.msrb.gmra.mxu1 %v242_v12  ;;  %351 = vmatmul.bf16.vlgmr.msra.gmra.mxu3 %v242_v12 }
 0x15f   :  { %v237_v13 = vpop.f32.mrf.mxu1 }
 0x167   :  { %v239_v14 = vpop.f32.mrf.mxu1 }
 0x168   :  { %v243_v15 = vpack.c.bf16 %v239_v14, %v237_v13 }
 0x16a   :  { %337 = vmatmul.bf16.vlgmr.msra.gmra.mxu2 %v243_v15  ;;  %356 = vmatmul.bf16.gmra.mxu3 %v243_v15 }
 0x1d7   :  { %v333_v5 = vpop.f32.mrf.mxu1 }
 0x1d8   :  { %362 = vst [vmem:[#allocation7] sm:$0xff] %v333_v5 }
 0x1dd   :  { %v352_v16 = vpop.f32.mrf.mxu3 }
 0x1de   :  { %363 = vst [vmem:[#allocation7 + $0x8] sm:$0xff] %v352_v16 }
 0x1df   :  { %v335_v6 = vpop.f32.mrf.mxu1 }
 0x1e0   :  { %364 = vst [vmem:[#allocation7 + $0x10] sm:$0xff] %v335_v6 }
 0x1e5   :  { %v354_v17 = vpop.f32.mrf.mxu3 }
 0x1e6   :  { %365 = vst [vmem:[#allocation7 + $0x18] sm:$0xff] %v354_v17 }
 0x1ed   :  { %v338_v18 = vpop.f32.mrf.mxu2  ;;  %v357_v19 = vpop.f32.mrf.mxu3 }
 0x1ee   :  { %366 = vst [vmem:[#allocation7 + $0x20] sm:$0xff] %v338_v18 }
 0x1ef   :  { %367 = vst [vmem:[#allocation7 + $0x28] sm:$0xff] %v357_v19 }
 0x1f5   :  { %v340_v20 = vpop.f32.mrf.mxu2  ;;  %v359_v21 = vpop.f32.mrf.mxu3 }
 0x1f6   :  { %368 = vst [vmem:[#allocation7 + $0x30] sm:$0xff] %v340_v20 }
 0x1f7   :  { %369 = vst [vmem:[#allocation7 + $0x38] sm:$0xff] %v359_v21 }
 0x1f8   :  { %382 = dma.vmem_to_hbm [thread:$0]  %s375_s22, 1024, %s377_s6, [#allocation4], %s682_s25, %s682_s25, %s683_s26  }
 0x1f9   :  { %669 = dma.done.wait [#allocation4], 1024  }
 0x1fa   :  { %670 = vsyncadd [#allocation4], 4294966272 }
 0x1fb   :  { %671 = dma.done.wait [#allocation9], 16  }
 0x1fc   :  { %672 = vsyncadd [#allocation9], 4294967280 }
 0x1fd   :  { %402 = vsyncpa [#allocation3], 1 }
 0x1fe   :  { %403 = vsyncpa [#allocation6], 1 }
 0x1ff   :  { %404 = vsyncpa [#allocation4], 1 }
 0x200   :  { %405 = vsyncpa [#allocation9], 1 }

// kernel: tpu_custom_call.1
= control target key start
LH: loop header
LB: loop body
LE: loop exit
PB: predicated region body
PF: predicated region fallthrough
CT: control target
= control target key end

     0   :  { %12 = vsyncpa [#allocation3], 0  ;;  %s768_s0 = inlined_call_operand.vmem [shape: f32[1,16,128], index: 0, kind: input, shape index: {}]   ;;  %s769_s1 = inlined_call_operand.vmem [shape: f32[1,128], index: 1, kind: input, shape index: {}]   ;;  %s770_s2 = inlined_call_operand.hbm [shape: bf16[128,128], index: 2, kind: input, shape index: {}]   ;;  %s771_s3 = inlined_call_operand.vmem [shape: bf16[32,16], index: 3, kind: input, shape index: {}]   ;;  %s772_s4 = inlined_call_operand.hbm [shape: bf16[128,256], index: 4, kind: input, shape index: {}]   ;;  %s773_s5 = inlined_call_operand.hbm [shape: f32[1,32,256], index: 5, kind: output, shape index: {0}]   ;;  %s774_s6 = inlined_call_operand.hbm [shape: f32[1,1,128], index: 6, kind: output, shape index: {1}]  }
   0x1   :  { %13 = vsyncpa [#allocation6], 0 }
   0x2   :  { %14 = vsyncpa [#allocation4], 0 }
   0x3   :  { %15 = vsyncpa [#allocation9], 0  ;;  %s24_s23 = sshll.u32 %s770_s2, 4  ;;  %s673_s24 = smov [#allocation2]   ;;  %s25_s23 = int_to_ptr.hbm [resolvable:$true] %s24_s23 }
   0x4   :  { %s26_s25 = sshll.u32 %s673_s24, 4  ;;  %s39_s28 = sshll.u32 %s772_s4, 4  ;;  %s27_s25 = int_to_ptr.vmem [resolvable:$true] %s26_s25  ;;  %s40_s28 = int_to_ptr.hbm [resolvable:$true] %s39_s28 }
   0x5   :  { %s674_s29 = smov 64   ;;  %s675_s30 = smov 4  }
   0x6   :  { %32 = dma.hbm_to_vmem [thread:$0]  %s25_s23, 1024, %s27_s25, [#allocation3], %s674_s29, %s674_s29, %s675_s30  }
   0x7   :  { %s676_s7 = smov [#allocation5]   ;;  %s677_s9 = smov 128  }
   0x8   :  { %s41_s8 = sshll.u32 %s676_s7, 4  ;;  %s678_s10 = smov 8   ;;  %s42_s8 = int_to_ptr.vmem [resolvable:$true] %s41_s8 }
   0x9   :  { %47 = dma.hbm_to_vmem [thread:$0]  %s40_s28, 2048, %s42_s8, [#allocation6], %s677_s9, %s677_s9, %s678_s10  }
   0xa   :  { %665 = dma.done.wait [#allocation3], 1024  }
   0xb   :  { %666 = vsyncadd [#allocation3], 4294966272 }
   0xc   :  { %667 = dma.done.wait [#allocation6], 2048  }
   0xd   :  { %668 = vsyncadd [#allocation6], 4294965248  ;;  %v538_v0 = vld [vmem:[#allocation2 + $0x38] sm:$0xff]   ;;  %v537_v1 = vld [vmem:[#allocation2 + $0x30] sm:$0xff]   ;;  %v90_v24 = vlaneseq  ;;  %v679_v55 = vmov 0.0   ;;  %vm216_vm6 = vcmask 130048  }
   0xe   :  { %v531_v2 = vunpack.c.h.bf16 %v538_v0  ;;  %v530_v3 = vunpack.c.l.bf16 %v538_v0  ;;  %v527_v4 = vunpack.c.h.bf16 %v537_v1  ;;  %v728_v5 = vld [vmem:[%s768_s0] sm:$0xff]  ;;  %v733_v6 = vld [vmem:[%s768_s0 + $0x8] sm:$0xff]  ;;  %v526_v8 = vunpack.c.l.bf16 %v537_v1  ;;  %v534_v19 = vld [vmem:[#allocation2 + $0x18] sm:$0xff]   ;;  %s390_s20 = sshll.u32 %s774_s6, 4  ;;  %s681_s21 = smov [#allocation7]   ;;  %s391_s20 = int_to_ptr.hbm [resolvable:$true] %s390_s20 }
   0xf   :  { %v536_v7 = vld [vmem:[#allocation2 + $0x28] sm:$0xff]   ;;  %v131_v9 = vand.u32 2147483647, %v728_v5  ;;  %v132_v10 = vand.u32 2147483647, %v733_v6  ;;  %v535_v12 = vld [vmem:[#allocation2 + $0x20] sm:$0xff]   ;;  %v515_v21 = vunpack.c.h.bf16 %v534_v19  ;;  %v514_v23 = vunpack.c.l.bf16 %v534_v19 }
  0x10   :  { %175 = vmatpush.msra.mxu0 %v531_v2  ;;  %v523_v11 = vunpack.c.h.bf16 %v536_v7  ;;  %v522_v15 = vunpack.c.l.bf16 %v536_v7  ;;  %v519_v18 = vunpack.c.h.bf16 %v535_v12  ;;  %v518_v20 = vunpack.c.l.bf16 %v535_v12  ;;  %v533_v22 = vld [vmem:[#allocation2 + $0x10] sm:$0xff]   ;;  %v532_v30 = vld [vmem:[#allocation2 + $0x8] sm:$0xff]   ;;  %v501_v39 = vld [vmem:[#allocation2] sm:$0xff]   ;;  %s374_s22 = sshll.u32 %s681_s21, 4  ;;  %s376_s6 = sshll.u32 %s773_s5, 4  ;;  %s375_s22 = int_to_ptr.vmem [resolvable:$true] %s374_s22  ;;  %s377_s6 = int_to_ptr.hbm [resolvable:$true] %s376_s6 }
  0x11   :  { %v133_v13 = vsub.f32 0.0, %v131_v9  ;;  %v134_v14 = vsub.f32 0.0, %v132_v10  ;;  %v511_v27 = vunpack.c.h.bf16 %v533_v22  ;;  %v510_v33 = vunpack.c.l.bf16 %v533_v22  ;;  %v558_v61 = vld [vmem:[%s769_s1] ss:$0 sm:$0xff]  ;;  %v497_v22 = vld [vmem:[#allocation5 + $0x64] sm:$0xf0] }
  0x12   :  { %176 = vmatpush.msra.mxu0 %v530_v3  ;;  %v91_v34 = vshrl.u32 %v90_v24, 7  ;;  %v507_v36 = vunpack.c.h.bf16 %v532_v30  ;;  %v506_v41 = vunpack.c.l.bf16 %v532_v30  ;;  %v503_v45 = vunpack.c.h.bf16 %v501_v39  ;;  %v468_v19 = vld [vmem:[#allocation5 + $0x60] sm:$0xf]  ;;  %v470_v24 = vld [vmem:[#allocation5 + $0x68] sm:$0xf0]  ;;  %s682_s25 = smov 256  }
  0x13   :  { %v135_v16 = vmul.f32 1.442695, %v133_v13  ;;  %v137_v17 = vmul.f32 1.442695, %v134_v14  ;;  %v125_v46 = vmax.f32 %v728_v5, 0.0  ;;  %v126_v50 = vmax.f32 %v733_v6, 0.0 }
  0x14   :  { %177 = vmatpush.msra.mxu0 %v527_v4  ;;  %v92_v42 = vadd.s32 8, %v91_v34  ;;  %vm93_vm1 = vcmp.ge.s32.totalorder %v91_v34, 2  ;;  %v502_v52 = vunpack.c.l.bf16 %v501_v39  ;;  %vm127_vm4 = vcmp.ne.f32.partialorder %v728_v5, %v728_v5  ;;  %v462_v30 = vld [vmem:[#allocation5 + $0x58] sm:$0xf0]  ;;  %v490_v47 = vld [vmem:[#allocation5 + $0x34] sm:$0xf] }
  0x15   :  { %559 = vpow2.f32 %v135_v16  ;;  %v406_v56 = vsel %vm93_vm1, 1.0, %v679_v55  ;;  %vm128_vm5 = vcmp.ne.f32.partialorder %v733_v6, %v733_v6  ;;  %v499_v16 = vld [vmem:[#allocation5 + $0x74] sm:$0xf0]  ;;  %s683_s26 = smov 16  }
  0x16   :  { %178 = vmatpush.msra.mxu0 %v526_v8  ;;  %561 = vpow2.f32 %v137_v17  ;;  %vm96_vm3 = vcmp.lt.s32.totalorder %v92_v42, 14  ;;  %v493_v42 = vld [vmem:[#allocation5 + $0x44] sm:$0xf0] }
  0x17   :  { %v407_v59 = vsel %vm96_vm3, 1.0, %v679_v55  ;;  %v489_v55 = vld [vmem:[#allocation5 + $0x24] sm:$0xf0] }
  0x18   :  { %179 = vmatpush.msra.mxu0 %v523_v11 }
  0x1a   :  { %180 = vmatpush.msra.mxu0 %v522_v15 }
  0x1b   :  { %v560_v25 = vpop.eup %559 }
  0x1c   :  { %181 = vmatpush.msra.mxu0 %v519_v18  ;;  %v562_v26 = vpop.eup %561  ;;  %v139_v28 = vadd.f32 1.0, %v560_v25  ;;  %v142_v29 = vmul.f32 -0.5, %v560_v25  ;;  %v145_v37 = vand.u32 2147483647, %v560_v25  ;;  %v478_v18 = vld [vmem:[#allocation5 + $0x78] sm:$0xf0] }
  0x1d   :  { %v148_v31 = vadd.f32 1.0, %v562_v26  ;;  %v151_v32 = vmul.f32 -0.5, %v562_v26  ;;  %v154_v40 = vand.u32 2147483647, %v562_v26 }
  0x1e   :  { %182 = vmatpush.msra.mxu0 %v518_v20  ;;  %563 = vlog2.f32 %v139_v28  ;;  %v143_v35 = vadd.f32 1.0, %v142_v29  ;;  %vm738_vm0 = vcmp.lt.f32.partialorder %v145_v37, 0.0004427343  ;;  %v469_v28 = vor.u32 %v497_v22, %v468_v19  ;;  %v494_v29 = vld [vmem:[#allocation5 + $0x54] sm:$0xf] }
  0x1f   :  { %565 = vlog2.f32 %v148_v31  ;;  %v152_v38 = vadd.f32 1.0, %v151_v32  ;;  %vm155_vm2 = vcmp.lt.f32.partialorder %v154_v40, 0.0004427343  ;;  %v460_v31 = vld [vmem:[#allocation5 + $0x50] sm:$0xf] }
  0x20   :  { %183 = vmatpush.msra.mxu0 %v515_v21  ;;  %v144_v43 = vmul.f32 %v560_v25, %v143_v35  ;;  %v495_v32 = vld [vmem:[#allocation5 + $0x54] sm:$0xf0]  ;;  %v465_v35 = vor.u32 %v494_v29, %v462_v30  ;;  %v454_v40 = vld [vmem:[#allocation5 + $0x48] sm:$0xf0] }
  0x21   :  { %v153_v48 = vmul.f32 %v562_v26, %v152_v38  ;;  %v461_v39 = vor.u32 %v495_v32, %v460_v31 }
  0x22   :  { %184 = vmatpush.msra.mxu0 %v514_v23  ;;  %v496_v23 = vld [vmem:[#allocation5 + $0x64] sm:$0xf] }
  0x23   :  { %v473_v26 = vor.u32 %v496_v23, %v470_v24 }
  0x24   :  { %185 = vmatpush.msra.mxu0 %v511_v27  ;;  %v564_v44 = vpop.eup %563 }
  0x25   :  { %v566_v49 = vpop.eup %565  ;;  %v141_v51 = vmul.f32 0.6931472, %v564_v44  ;;  %v482_v44 = vld [vmem:[%s771_s3] sm:$0xff] }
  0x26   :  { %186 = vmatpush.msra.mxu0 %v510_v33  ;;  %v150_v53 = vmul.f32 0.6931472, %v566_v49  ;;  %v444_v49 = vld [vmem:[#allocation5 + $0x30] sm:$0xf] }
  0x27   :  { %v147_v54 = vsel %vm738_vm0, %v144_v43, %v141_v51 }
  0x28   :  { %187 = vmatpush.msra.mxu0 %v507_v36  ;;  %v156_v57 = vsel %vm155_vm2, %v153_v48, %v150_v53  ;;  %v157_v58 = vadd.f32 %v147_v54, %v125_v46  ;;  %v492_v36 = vld [vmem:[#allocation5 + $0x44] sm:$0xf]  ;;  %v446_v48 = vld [vmem:[#allocation5 + $0x38] sm:$0xf0]  ;;  %v483_v53 = vld [vmem:[%s771_s3 + $0x8] sm:$0xff]  ;;  %s680_s3 = smov [#allocation8]  }
  0x29   :  { %v158_v60 = vadd.f32 %v156_v57, %v126_v50  ;;  %v491_v50 = vld [vmem:[#allocation5 + $0x34] sm:$0xf0]  ;;  %v449_v51 = vor.u32 %v490_v47, %v446_v48  ;;  %v436_v54 = vld [vmem:[#allocation5 + $0x20] sm:$0xf]  ;;  %s388_s17 = sshll.u32 %s680_s3, 4  ;;  %s389_s17 = int_to_ptr.vmem [resolvable:$true] %s388_s17 }
  0x2a   :  { %188 = vmatpush.msra.mxu0 %v506_v41  ;;  %v159_v62 = vsel %vm127_vm4, %v728_v5, %v157_v58  ;;  %v476_v5 = vld [vmem:[#allocation5 + $0x70] sm:$0xf]  ;;  %v452_v41 = vld [vmem:[#allocation5 + $0x40] sm:$0xf]  ;;  %v437_v57 = vor.u32 %v489_v55, %v436_v54  ;;  %v438_v58 = vld [vmem:[#allocation5 + $0x28] sm:$0xf0] }
  0x2b   :  { %v160_v63 = vsel %vm128_vm5, %v733_v6, %v158_v60  ;;  %v161_v0 = vmul.f32 %v406_v56, %v159_v62  ;;  %v498_v6 = vld [vmem:[#allocation5 + $0x74] sm:$0xf]  ;;  %v477_v17 = vor.u32 %v499_v16, %v476_v5  ;;  %v453_v46 = vor.u32 %v493_v42, %v452_v41  ;;  %v488_v56 = vld [vmem:[#allocation5 + $0x24] sm:$0xf]  ;;  %v428_v60 = vld [vmem:[#allocation5 + $0x10] sm:$0xf] }
  0x2c   :  { %189 = vmatpush.msra.mxu0 %v503_v45  ;;  %v162_v1 = vmul.f32 %v407_v59, %v160_v63  ;;  %v481_v21 = vor.u32 %v498_v6, %v478_v18  ;;  %v457_v45 = vor.u32 %v492_v36, %v454_v40  ;;  %v441_v59 = vor.u32 %v488_v56, %v438_v58  ;;  %v486_v62 = vld [vmem:[#allocation5 + $0x14] sm:$0xf] }
  0x2d   :  { %v166_v2 = vmul.f32 %v558_v61, %v161_v0  ;;  %539 = vmatpush.bf16.msra.mxu2 %v477_v17  ;;  %v430_v0 = vld [vmem:[#allocation5 + $0x18] sm:$0xf0] }
  0x2e   :  { %190 = vmatpush.msra.mxu0 %v502_v52  ;;  %v167_v3 = vmul.f32 %v558_v61, %v162_v1  ;;  %343 = vmatpush.bf16.msra.mxu3 %v481_v21  ;;  %v445_v52 = vor.u32 %v491_v50, %v444_v49  ;;  %v487_v61 = vld [vmem:[#allocation5 + $0x14] sm:$0xf0]  ;;  %v433_v1 = vor.u32 %v486_v62, %v430_v0 }
  0x2f   :  { %v429_v63 = vor.u32 %v487_v61, %v428_v60 }
  0x30   :  { %v168_v4 = vadd.f32 %v167_v3, %v166_v2 }
  0x31   :  { %540 = vmatpush.bf16.msra.mxu2 %v469_v28 }
  0x32   :  { %v169_v7 = vrot.slane %v168_v4, 4  ;;  %344 = vmatpush.bf16.msra.mxu3 %v473_v26 }
  0x34   :  { %v170_v8 = vadd.f32 %v169_v7, %v168_v4  ;;  %v484_v4 = vld [vmem:[#allocation5 + $0x4] sm:$0xf] }
  0x35   :  { %541 = vmatpush.bf16.msra.mxu2 %v461_v39 }
  0x36   :  { %v171_v9 = vrot.slane %v170_v8, 2  ;;  %345 = vmatpush.bf16.msra.mxu3 %v465_v35 }
  0x38   :  { %v172_v10 = vadd.f32 %v171_v9, %v170_v8  ;;  %v422_v8 = vld [vmem:[#allocation5 + $0x8] sm:$0xf0] }
  0x39   :  { %542 = vmatpush.bf16.msra.mxu2 %v453_v46  ;;  %v425_v9 = vor.u32 %v484_v4, %v422_v8 }
  0x3a   :  { %v173_v11 = vrot.slane %v172_v10, 1  ;;  %346 = vmatpush.bf16.msra.mxu3 %v457_v45 }
  0x3c   :  { %v174_v12 = vadd.f32 %v173_v11, %v172_v10 }
  0x3d   :  { %543 = vmatpush.bf16.msra.mxu2 %v445_v52 }
  0x3e   :  { %191 = vmatmul.f32.vlgmr.msra.gmra.mxu0 %v174_v12  ;;  %347 = vmatpush.bf16.msra.mxu3 %v449_v51 }
  0x41   :  { %544 = vmatpush.bf16.msra.mxu2 %v437_v57 }
  0x42   :  { %348 = vmatpush.bf16.msra.mxu3 %v441_v59 }
  0x45   :  { %545 = vmatpush.bf16.msra.mxu2 %v429_v63 }
  0x46   :  { %349 = vmatpush.bf16.msra.mxu3 %v433_v1 }
  0x4a   :  { %350 = vmatpush.bf16.msra.mxu3 %v425_v9 }
  0xbb   :  { %v192_v13 = vpop.f32.mrf.mxu0 }
  0xbc   :  { %v195_v14 = vmul.f32 0.0069444445, %v192_v13  ;;  %v197_v15 = vmax.f32 %v192_v13, 1e-12 }
  0xbe   :  { %196 = vst [vmem:[#allocation8] sm:$0x1] %v195_v14  ;;  %567 = vrcp.f32 %v197_v15 }
  0xbf   :  { %393 = dma.vmem_to_hbm [thread:$0]  %s389_s17, 16, %s391_s20, [#allocation9]  }
  0xc4   :  { %v568_v20 = vpop.eup %567 }
  0xc5   :  { %v199_v25 = vmul.f32 27.36, %v568_v20 }
  0xc7   :  { %v200_v27 = vperm.slane %v199_v25, 0 }
  0xc9   :  { %v201_v33 = vmul.f32 %v200_v27, %v166_v2  ;;  %v202_v34 = vmul.f32 %v200_v27, %v167_v3  ;;  %v420_v2 = vld [vmem:[#allocation5] sm:$0xf]  ;;  %v485_v3 = vld [vmem:[#allocation5 + $0x4] sm:$0xf0] }
  0xca   :  { %v421_v7 = vor.u32 %v485_v3, %v420_v2 }
  0xcb   :  { %v203_v37 = vadd.f32 0.01, %v201_v33  ;;  %v204_v38 = vadd.f32 0.01, %v202_v34 }
  0xcc   :  { %546 = vmatpush.bf16.msra.mxu2 %v421_v7 }
  0xcd   :  { %v205_v43 = vpack.c.bf16 %v204_v38, %v203_v37 }
  0xcf   :  { %230 = vmatpush.bf16.msra.mxu1 %v205_v43 }
  0xd2   :  { %416 = vmatmul.msk.bf16.vlgmr.msra.gmra.mxu1 %vm216_vm6, %v482_v44 }
  0xd3   :  { %324 = vmatpush.bf16.msrb.mxu1 %v477_v17 }
  0xd7   :  { %325 = vmatpush.bf16.msrb.mxu1 %v469_v28 }
  0xdb   :  { %326 = vmatpush.bf16.msrb.mxu1 %v461_v39 }
  0xdf   :  { %327 = vmatpush.bf16.msrb.mxu1 %v453_v46 }
  0xe2   :  { %417 = vmatmul.msk.bf16.gmra.mxu1 %vm216_vm6, %v483_v53 }
  0xe3   :  { %328 = vmatpush.bf16.msrb.mxu1 %v445_v52 }
  0xe7   :  { %329 = vmatpush.bf16.msrb.mxu1 %v437_v57 }
  0xeb   :  { %330 = vmatpush.bf16.msrb.mxu1 %v429_v63 }
  0xef   :  { %331 = vmatpush.bf16.msrb.mxu1 %v421_v7 }
 0x14f   :  { %v232_v10 = vpop.f32.mrf.mxu1 }
 0x157   :  { %v234_v11 = vpop.f32.mrf.mxu1 }
 0x158   :  { %v242_v12 = vpack.c.bf16 %v234_v11, %v232_v10 }
 0x15a   :  { %332 = vmatmul.bf16.vlgmr.msrb.gmra.mxu1 %v242_v12  ;;  %351 = vmatmul.bf16.vlgmr.msra.gmra.mxu3 %v242_v12 }
 0x15f   :  { %v237_v13 = vpop.f32.mrf.mxu1 }
 0x167   :  { %v239_v14 = vpop.f32.mrf.mxu1 }
 0x168   :  { %v243_v15 = vpack.c.bf16 %v239_v14, %v237_v13 }
 0x16a   :  { %337 = vmatmul.bf16.vlgmr.msra.gmra.mxu2 %v243_v15  ;;  %356 = vmatmul.bf16.gmra.mxu3 %v243_v15 }
 0x1d7   :  { %v333_v5 = vpop.f32.mrf.mxu1 }
 0x1d8   :  { %362 = vst [vmem:[#allocation7] sm:$0xff] %v333_v5 }
 0x1dd   :  { %v352_v16 = vpop.f32.mrf.mxu3 }
 0x1de   :  { %363 = vst [vmem:[#allocation7 + $0x8] sm:$0xff] %v352_v16 }
 0x1df   :  { %v335_v6 = vpop.f32.mrf.mxu1 }
 0x1e0   :  { %364 = vst [vmem:[#allocation7 + $0x10] sm:$0xff] %v335_v6 }
 0x1e5   :  { %v354_v17 = vpop.f32.mrf.mxu3 }
 0x1e6   :  { %365 = vst [vmem:[#allocation7 + $0x18] sm:$0xff] %v354_v17 }
 0x1ed   :  { %v338_v18 = vpop.f32.mrf.mxu2  ;;  %v357_v19 = vpop.f32.mrf.mxu3 }
 0x1ee   :  { %366 = vst [vmem:[#allocation7 + $0x20] sm:$0xff] %v338_v18 }
 0x1ef   :  { %367 = vst [vmem:[#allocation7 + $0x28] sm:$0xff] %v357_v19 }
 0x1f5   :  { %v340_v20 = vpop.f32.mrf.mxu2  ;;  %v359_v21 = vpop.f32.mrf.mxu3 }
 0x1f6   :  { %368 = vst [vmem:[#allocation7 + $0x30] sm:$0xff] %v340_v20 }
 0x1f7   :  { %369 = vst [vmem:[#allocation7 + $0x38] sm:$0xff] %v359_v21 }
 0x1f8   :  { %382 = dma.vmem_to_hbm [thread:$0]  %s375_s22, 1024, %s377_s6, [#allocation4], %s682_s25, %s682_s25, %s683_s26  }
 0x1f9   :  { %669 = dma.done.wait [#allocation4], 1024  }
 0x1fa   :  { %670 = vsyncadd [#allocation4], 4294966272 }
 0x1fb   :  { %671 = dma.done.wait [#allocation9], 16  }
 0x1fc   :  { %672 = vsyncadd [#allocation9], 4294967280 }
 0x1fd   :  { %402 = vsyncpa [#allocation3], 1 }
 0x1fe   :  { %403 = vsyncpa [#allocation6], 1 }
 0x1ff   :  { %404 = vsyncpa [#allocation4], 1 }
 0x200   :  { %405 = vsyncpa [#allocation9], 1 }

</bundles_post_ra>
